<compile_context>
chip_gen: v7x
topology: tpu7x:2x2x1
jax: 0.10.0
libtpu: 0.0.40
codegen_flags: <defaults>
</compile_context>

<pallas_src>
import functools

import jax
import jax.numpy as jnp
from jax.experimental import pallas as pl
from jax.experimental.pallas import tpu as pltpu


_LANE = 128     # TPU lane width (last dim)
_SUBLANE = 8    # f32 sublane width (second-to-last dim)


def _round_up(n, m):
    return ((n + m - 1) // m) * m


def _num_tensorcores():
    """Best-effort TensorCores-per-chip count (v7x has 2); defaults to 1."""
    try:
        info = pltpu.get_tpu_info()
    except Exception:
        return 1
    for attr in ("num_cores", "core_count", "num_tensorcores",
                 "tensorcores_per_chip", "num_tensor_cores"):
        n = getattr(info, attr, None)
        if isinstance(n, int) and n >= 1:
            return n
    return 1


def _layernorm(h, gamma, beta, n, eps=1e-5):
    """PyTorch LayerNorm (biased variance, eps inside rsqrt) over the last dim.

    Single pass: row sum + row sum-of-squares divided by the TRUE width `n`.
    `h` may carry zero-padded lanes beyond `n`: they contribute exact zeros to
    both sums, and zero-padded gamma/beta keep the padded output lanes at 0.
    """
    s = jnp.sum(h, axis=-1, keepdims=True)
    ss = jnp.sum(h * h, axis=-1, keepdims=True)
    mu = s * (1.0 / n)
    var = jnp.maximum(ss * (1.0 / n) - mu * mu, 0.0)
    return (h - mu) * jax.lax.rsqrt(var + eps) * gamma + beta


def resblock_kernel(x_ref, w1_ref, w2_ref, w3_ref, w4_ref, vec_ref, b4_ref,
                    o_ref, *, hidden_dim):
    x = x_ref[...]                 # (tb, D) f32, unpadded feature dim
    mm = w1_ref.dtype              # matmul operand dtype (bf16 by default)

    # packed (8, Hp) bias / LayerNorm parameter rows
    b1, g1, be1 = vec_ref[0:1], vec_ref[1:2], vec_ref[2:3]
    b2, b3 = vec_ref[3:4], vec_ref[4:5]
    g2, be2 = vec_ref[5:6], vec_ref[6:7]

    # --- i = 1 : actfun (Linear + ReLU), LayerNorm(H), Linear(H, H) ---
    h = jnp.dot(x.astype(mm), w1_ref[...],
                preferred_element_type=jnp.float32) + b1
    h = jnp.maximum(h, 0.0)
    h = _layernorm(h, g1, be1, hidden_dim)
    h = jnp.dot(h.astype(mm), w2_ref[...],
                preferred_element_type=jnp.float32) + b2

    # --- i = 2 (last) : actfun (Linear + ReLU), LayerNorm(H), Linear(H, D) ---
    h = jnp.dot(h.astype(mm), w3_ref[...],
                preferred_element_type=jnp.float32) + b3
    h = jnp.maximum(h, 0.0)
    h = _layernorm(h, g2, be2, hidden_dim)
    h = jnp.dot(h.astype(mm), w4_ref[...],
                preferred_element_type=jnp.float32) + b4_ref[...]

    # residual connection in f32 (output feature dim is unpadded)
    o_ref[...] = (h + x).astype(o_ref.dtype)


def resblock_forward(x, params, *, target_tile=1024, matmul_dtype=jnp.bfloat16):
    """x: (B, D) float32.  params: 12 f32 arrays (see make_params)."""
    B, D = x.shape
    (w1, b1, g1, be1, w2, b2, w3, b3, g2, be2, w4, b4) = params
    H = w1.shape[1]
    mm_dtype = jnp.float32 if matmul_dtype is None else matmul_dtype

    # --- lane-dense padding of the HIDDEN dim only (weights/LN params are
    #     tiny and VMEM-resident; x/out stay unpadded so HBM traffic is not
    #     inflated).  Padded gamma/beta/bias are zero -> padded lanes stay 0
    #     and LayerNorm uses exact sums over the true H. ---
    Hp = _round_up(max(H, _LANE), _LANE)

    w1p = jnp.zeros((D, Hp), mm_dtype).at[:, :H].set(w1.astype(mm_dtype))
    w2p = jnp.zeros((Hp, Hp), mm_dtype).at[:H, :H].set(w2.astype(mm_dtype))
    w3p = jnp.zeros((Hp, Hp), mm_dtype).at[:H, :H].set(w3.astype(mm_dtype))
    w4p = jnp.zeros((Hp, D), mm_dtype).at[:H, :].set(w4.astype(mm_dtype))
    vecs = jnp.zeros((_SUBLANE, Hp), jnp.float32)
    for r, v in enumerate((b1, g1, be1, b2, b3, g2, be2)):
        vecs = vecs.at[r, :H].set(v.reshape(-1))
    kparams = (w1p, w2p, w3p, w4p, vecs, b4)

    # --- batch tile: multiple of the f32 sublane width, capped at target_tile.
    #     Force a split only when the chip has >= 2 TensorCores (v7x): then aim
    #     for >= 2 grid steps per core (so each core's pipeline can prefetch
    #     block i+1 behind block i), never shrinking tiles below 256 rows.
    #     On 1-TC chips (v5e/v6e) the grid is a serial loop, so keep 1 max tile. ---
    bp8 = _round_up(B, _SUBLANE)
    tb = min(bp8, target_tile)
    ncores = _num_tensorcores()
    if ncores >= 2:
        want_steps = 2 * ncores
        if bp8 >= want_steps * 256 and (bp8 + tb - 1) // tb < want_steps:
            tb = max(256, _round_up(-(-bp8 // want_steps), _SUBLANE))
    Bp = _round_up(B, tb)
    grid = (Bp // tb,)

    xp = x if Bp == B else jnp.zeros((Bp, D), x.dtype).at[:B, :].set(x)
    # NOTE: streaming x/out in bf16 would halve the remaining HBM bytes, but is
    # a precision tradeoff (residual add); kept f32 to preserve module numerics.

    # --- VMEM budget: streamed x/out tiles (double-buffered) + resident params
    #     + live f32 intermediates.  Raise the scoped limit only when needed,
    #     capped v7x-safely (64 MiB physical VMEM there). ---
    param_bytes = sum(int(p.size) * p.dtype.itemsize for p in kparams)
    act_bytes = 2 * 2 * tb * D * 4                 # x + out, double-buffered
    tmp_bytes = 4 * tb * max(Hp, D) * 4            # live f32 intermediates
    vmem_est = act_bytes + 2 * param_bytes + tmp_bytes
    cp_kwargs = dict(dimension_semantics=("parallel",))
    if vmem_est > (16 << 20):
        cap = 48 << 20
        try:
            cap = min(cap, int(pltpu.get_tpu_info().vmem_capacity_bytes) - (16 << 20))
        except Exception:
            pass
        cp_kwargs["vmem_limit_bytes"] = int(min(max(2 * vmem_est, 32 << 20), cap))

    # --- cost estimate so XLA can schedule/overlap this small kernel ---
    flops = 2 * Bp * (D * Hp + 2 * Hp * Hp + Hp * D)
    bytes_accessed = 2 * Bp * D * 4 + param_bytes
    cost = pl.CostEstimate(flops=int(flops),
                           transcendentals=int(2 * Bp),   # one rsqrt/row per LN
                           bytes_accessed=int(bytes_accessed))

    def build(single_buffer_weights):
        def const_spec(a):
            # Grid-invariant index map: block revisited every step, so the
            # params stay resident in VMEM (no per-step DMA); one buffer is
            # enough since the block never changes.
            nd = a.ndim
            idx = lambda i, _nd=nd: (0,) * _nd
            if single_buffer_weights:
                return pl.BlockSpec(a.shape, idx, pipeline_mode=pl.Buffered(1))
            return pl.BlockSpec(a.shape, idx)

        return pl.pallas_call(
            functools.partial(resblock_kernel, hidden_dim=H),
            out_shape=jax.ShapeDtypeStruct((Bp, D), x.dtype),
            grid_spec=pltpu.PrefetchScalarGridSpec(
                num_scalar_prefetch=0,
                grid=grid,
                in_specs=[pl.BlockSpec((tb, D), lambda i: (i, 0))]
                         + [const_spec(p) for p in kparams],
                out_specs=pl.BlockSpec((tb, D), lambda i: (i, 0)),
            ),
            compiler_params=pltpu.CompilerParams(**cp_kwargs),
            cost_estimate=cost,
        )

    try:
        out = build(True)(xp, *kparams)
    except Exception:
        # Fallback: drop the single-buffer request if this JAX build rejects
        # pipeline_mode=pl.Buffered(1) (pure micro-opt, semantics identical).
        out = build(False)(xp, *kparams)

    return out if Bp == B else out[:B]


def resblock_ref(x, params, matmul_dtype=None):
    (w1, b1, g1, be1, w2, b2, w3, b3, g2, be2, w4, b4) = params
    H = w1.shape[1]
    md = jnp.float32 if matmul_dtype is None else matmul_dtype

    def mm(a, w):
        return jnp.dot(a.astype(md), w.astype(md),
                       preferred_element_type=jnp.float32)

    h = jnp.maximum(mm(x, w1) + b1, 0.0)
    h = _layernorm(h, g1, be1, H)
    h = mm(h, w2) + b2
    h = jnp.maximum(mm(h, w3) + b3, 0.0)
    h = _layernorm(h, g2, be2, H)
    h = mm(h, w4) + b4
    return h + x


def make_params(key, D, H):
    # Deterministic synthetic init.  NOTE: the PyTorch __init__ zero-inits the
    # final Linear (identity residual at init); here we use nonzero xavier-like
    # init everywhere so the kernel compute is actually exercised.
    ks = jax.random.split(key, 8)

    def xavier(k, fan_in, fan_out):
        std = (2.0 / (fan_in + fan_out)) ** 0.5
        return jax.random.normal(k, (fan_in, fan_out), jnp.float32) * std

    w1 = xavier(ks[0], D, H)                      # actfun linear (i=1)
    b1 = jax.random.normal(ks[1], (1, H), jnp.float32) * 0.01
    g1 = jnp.ones((1, H), jnp.float32)            # LayerNorm(H) gamma
    be1 = jnp.zeros((1, H), jnp.float32)          # LayerNorm(H) beta
    w2 = xavier(ks[2], H, H)                      # Linear(H, H)  (i=1)
    b2 = jax.random.normal(ks[3], (1, H), jnp.float32) * 0.01
    w3 = xavier(ks[4], H, H)                      # actfun linear (i=2)
    b3 = jax.random.normal(ks[5], (1, H), jnp.float32) * 0.01
    g2 = jnp.ones((1, H), jnp.float32)            # LayerNorm(H) gamma
    be2 = jnp.zeros((1, H), jnp.float32)          # LayerNorm(H) beta
    w4 = xavier(ks[6], H, D)                      # Linear(H, D)  (last)
    b4 = jax.random.normal(ks[7], (1, D), jnp.float32) * 0.01
    return (w1, b1, g1, be1, w2, b2, w3, b3, g2, be2, w4, b4)


if __name__ == "__main__":
    # nl = [32, 64, 64, 32], dropout_p = [0.0, 0.0] -> no Dropout layers.
    B, D, H = 16, 32, 64
    key = jax.random.PRNGKey(0)
    kx, kp = jax.random.split(key)
    x = jax.random.normal(kx, (B, D), jnp.float32)
    params = make_params(kp, D, H)

    out = jax.block_until_ready(resblock_forward(x, params))
    assert out.shape == (B, D) and out.dtype == jnp.float32

    # Tight check vs a matched-precision reference (bf16 matmul operands,
    # f32 accumulation, same single-pass LayerNorm — same numerics as kernel).
    ref_mm = jax.block_until_ready(resblock_ref(x, params, matmul_dtype=jnp.bfloat16))
    err_mm = float(jnp.max(jnp.abs(out - ref_mm)))
    assert err_mm < 2e-3, f"mismatch vs matched-precision reference: {err_mm}"

    # Loose check vs the pure-f32 module semantics (bounds bf16 operand drift).
    ref_f32 = jax.block_until_ready(resblock_ref(x, params))
    err_f32 = float(jnp.max(jnp.abs(out - ref_f32)))
    assert err_f32 < 1e-1, f"mismatch vs f32 reference: {err_f32}"

    print("KERNEL_OK")
</pallas_src>

<mosaic_0001>
module attributes {stable_mosaic.version = 11 : i64} {
  func.func @resblock_kernel(%arg0: i32, %arg1: memref<16x32xf32, #tpu.memory_space<vmem>>, %arg2: memref<32x128xbf16, #tpu.memory_space<vmem>>, %arg3: memref<128x128xbf16, #tpu.memory_space<vmem>>, %arg4: memref<128x128xbf16, #tpu.memory_space<vmem>>, %arg5: memref<128x32xbf16, #tpu.memory_space<vmem>>, %arg6: memref<8x128xf32, #tpu.memory_space<vmem>>, %arg7: memref<1x32xf32, #tpu.memory_space<vmem>>, %arg8: memref<16x32xf32, #tpu.memory_space<vmem>>) attributes {dimension_semantics = [#tpu.dimension_semantics<parallel>], iteration_bounds = array<i64: 1>, scalar_prefetch = 0 : i64, scratch_operands = 0 : i64, tpu.core_type = #tpu.core_type<tc>, window_params = [{transform_indices = @transform_0, window_bounds = array<i64: 16, 32>}, {pipeline_mode = #tpu.pipeline_mode<synchronous>, transform_indices = @transform_1, window_bounds = array<i64: 32, 128>}, {pipeline_mode = #tpu.pipeline_mode<synchronous>, transform_indices = @transform_2, window_bounds = array<i64: 128, 128>}, {pipeline_mode = #tpu.pipeline_mode<synchronous>, transform_indices = @transform_3, window_bounds = array<i64: 128, 128>}, {pipeline_mode = #tpu.pipeline_mode<synchronous>, transform_indices = @transform_4, window_bounds = array<i64: 128, 32>}, {pipeline_mode = #tpu.pipeline_mode<synchronous>, transform_indices = @transform_5, window_bounds = array<i64: 8, 128>}, {pipeline_mode = #tpu.pipeline_mode<synchronous>, transform_indices = @transform_6, window_bounds = array<i64: 1, 32>}, {transform_indices = @transform_7, window_bounds = array<i64: 16, 32>}]} {
    %c0 = arith.constant 0 : index
    %c0_0 = arith.constant 0 : index
    %0 = vector.load %arg1[%c0, %c0_0] : memref<16x32xf32, #tpu.memory_space<vmem>>, vector<16x32xf32>
    %c0_1 = arith.constant 0 : index
    %c0_2 = arith.constant 0 : index
    %1 = vector.load %arg6[%c0_1, %c0_2] : memref<8x128xf32, #tpu.memory_space<vmem>>, vector<1x128xf32>
    %c1 = arith.constant 1 : index
    %c0_3 = arith.constant 0 : index
    %2 = vector.load %arg6[%c1, %c0_3] : memref<8x128xf32, #tpu.memory_space<vmem>>, vector<1x128xf32>
    %c2 = arith.constant 2 : index
    %c0_4 = arith.constant 0 : index
    %3 = vector.load %arg6[%c2, %c0_4] : memref<8x128xf32, #tpu.memory_space<vmem>>, vector<1x128xf32>
    %c3 = arith.constant 3 : index
    %c0_5 = arith.constant 0 : index
    %4 = vector.load %arg6[%c3, %c0_5] : memref<8x128xf32, #tpu.memory_space<vmem>>, vector<1x128xf32>
    %c4 = arith.constant 4 : index
    %c0_6 = arith.constant 0 : index
    %5 = vector.load %arg6[%c4, %c0_6] : memref<8x128xf32, #tpu.memory_space<vmem>>, vector<1x128xf32>
    %c5 = arith.constant 5 : index
    %c0_7 = arith.constant 0 : index
    %6 = vector.load %arg6[%c5, %c0_7] : memref<8x128xf32, #tpu.memory_space<vmem>>, vector<1x128xf32>
    %c6 = arith.constant 6 : index
    %c0_8 = arith.constant 0 : index
    %7 = vector.load %arg6[%c6, %c0_8] : memref<8x128xf32, #tpu.memory_space<vmem>>, vector<1x128xf32>
    %8 = arith.truncf %0 : vector<16x32xf32> to vector<16x32xbf16>
    %c0_9 = arith.constant 0 : index
    %c0_10 = arith.constant 0 : index
    %9 = vector.load %arg2[%c0_9, %c0_10] : memref<32x128xbf16, #tpu.memory_space<vmem>>, vector<32x128xbf16>
    %cst = arith.constant dense<0.000000e+00> : vector<16x128xf32>
    %10 = tpu.matmul %8, %9, %cst {dimension_numbers = #tpu.dot_dimension_numbers<[1], [0], [0], [1], [0, 0, 1, 1], [], []>} : vector<16x32xbf16>, vector<32x128xbf16>, vector<16x128xf32> -> vector<16x128xf32>
    %11 = vector.broadcast %1 : vector<1x128xf32> to vector<16x128xf32>
    %12 = arith.addf %10, %11 : vector<16x128xf32>
    %cst_11 = arith.constant 0.000000e+00 : f32
    %13 = vector.broadcast %cst_11 : f32 to vector<16x128xf32>
    %14 = arith.maximumf %12, %13 : vector<16x128xf32>
    %cst_12 = arith.constant dense<0.000000e+00> : vector<16xf32>
    %15 = vector.multi_reduction <add>, %14, %cst_12 [1] : vector<16x128xf32> to vector<16xf32>
    %16 = vector.shape_cast %15 : vector<16xf32> to vector<16x1xf32>
    %17 = arith.mulf %14, %14 : vector<16x128xf32>
    %cst_13 = arith.constant dense<0.000000e+00> : vector<16xf32>
    %18 = vector.multi_reduction <add>, %17, %cst_13 [1] : vector<16x128xf32> to vector<16xf32>
    %19 = vector.shape_cast %18 : vector<16xf32> to vector<16x1xf32>
    %cst_14 = arith.constant 1.562500e-02 : f32
    %20 = vector.broadcast %cst_14 : f32 to vector<16x1xf32>
    %21 = arith.mulf %16, %20 : vector<16x1xf32>
    %cst_15 = arith.constant 1.562500e-02 : f32
    %22 = vector.broadcast %cst_15 : f32 to vector<16x1xf32>
    %23 = arith.mulf %19, %22 : vector<16x1xf32>
    %24 = arith.mulf %21, %21 : vector<16x1xf32>
    %25 = arith.subf %23, %24 : vector<16x1xf32>
    %cst_16 = arith.constant 0.000000e+00 : f32
    %26 = vector.broadcast %cst_16 : f32 to vector<16x1xf32>
    %27 = arith.maximumf %25, %26 : vector<16x1xf32>
    %28 = vector.broadcast %21 : vector<16x1xf32> to vector<16x128xf32>
    %29 = arith.subf %14, %28 : vector<16x128xf32>
    %cst_17 = arith.constant 9.99999974E-6 : f32
    %30 = vector.broadcast %cst_17 : f32 to vector<16x1xf32>
    %31 = arith.addf %27, %30 : vector<16x1xf32>
    %32 = math.rsqrt %31 : vector<16x1xf32>
    %33 = vector.broadcast %32 : vector<16x1xf32> to vector<16x128xf32>
    %34 = arith.mulf %29, %33 : vector<16x128xf32>
    %35 = vector.broadcast %2 : vector<1x128xf32> to vector<16x128xf32>
    %36 = arith.mulf %34, %35 : vector<16x128xf32>
    %37 = vector.broadcast %3 : vector<1x128xf32> to vector<16x128xf32>
    %38 = arith.addf %36, %37 : vector<16x128xf32>
    %39 = arith.truncf %38 : vector<16x128xf32> to vector<16x128xbf16>
    %c0_18 = arith.constant 0 : index
    %c0_19 = arith.constant 0 : index
    %40 = vector.load %arg3[%c0_18, %c0_19] : memref<128x128xbf16, #tpu.memory_space<vmem>>, vector<128x128xbf16>
    %cst_20 = arith.constant dense<0.000000e+00> : vector<16x128xf32>
    %41 = tpu.matmul %39, %40, %cst_20 {dimension_numbers = #tpu.dot_dimension_numbers<[1], [0], [0], [1], [0, 0, 1, 1], [], []>} : vector<16x128xbf16>, vector<128x128xbf16>, vector<16x128xf32> -> vector<16x128xf32>
    %42 = vector.broadcast %4 : vector<1x128xf32> to vector<16x128xf32>
    %43 = arith.addf %41, %42 : vector<16x128xf32>
    %44 = arith.truncf %43 : vector<16x128xf32> to vector<16x128xbf16>
    %c0_21 = arith.constant 0 : index
    %c0_22 = arith.constant 0 : index
    %45 = vector.load %arg4[%c0_21, %c0_22] : memref<128x128xbf16, #tpu.memory_space<vmem>>, vector<128x128xbf16>
    %cst_23 = arith.constant dense<0.000000e+00> : vector<16x128xf32>
    %46 = tpu.matmul %44, %45, %cst_23 {dimension_numbers = #tpu.dot_dimension_numbers<[1], [0], [0], [1], [0, 0, 1, 1], [], []>} : vector<16x128xbf16>, vector<128x128xbf16>, vector<16x128xf32> -> vector<16x128xf32>
    %47 = vector.broadcast %5 : vector<1x128xf32> to vector<16x128xf32>
    %48 = arith.addf %46, %47 : vector<16x128xf32>
    %cst_24 = arith.constant 0.000000e+00 : f32
    %49 = vector.broadcast %cst_24 : f32 to vector<16x128xf32>
    %50 = arith.maximumf %48, %49 : vector<16x128xf32>
    %cst_25 = arith.constant dense<0.000000e+00> : vector<16xf32>
    %51 = vector.multi_reduction <add>, %50, %cst_25 [1] : vector<16x128xf32> to vector<16xf32>
    %52 = vector.shape_cast %51 : vector<16xf32> to vector<16x1xf32>
    %53 = arith.mulf %50, %50 : vector<16x128xf32>
    %cst_26 = arith.constant dense<0.000000e+00> : vector<16xf32>
    %54 = vector.multi_reduction <add>, %53, %cst_26 [1] : vector<16x128xf32> to vector<16xf32>
    %55 = vector.shape_cast %54 : vector<16xf32> to vector<16x1xf32>
    %cst_27 = arith.constant 1.562500e-02 : f32
    %56 = vector.broadcast %cst_27 : f32 to vector<16x1xf32>
    %57 = arith.mulf %52, %56 : vector<16x1xf32>
    %cst_28 = arith.constant 1.562500e-02 : f32
    %58 = vector.broadcast %cst_28 : f32 to vector<16x1xf32>
    %59 = arith.mulf %55, %58 : vector<16x1xf32>
    %60 = arith.mulf %57, %57 : vector<16x1xf32>
    %61 = arith.subf %59, %60 : vector<16x1xf32>
    %cst_29 = arith.constant 0.000000e+00 : f32
    %62 = vector.broadcast %cst_29 : f32 to vector<16x1xf32>
    %63 = arith.maximumf %61, %62 : vector<16x1xf32>
    %64 = vector.broadcast %57 : vector<16x1xf32> to vector<16x128xf32>
    %65 = arith.subf %50, %64 : vector<16x128xf32>
    %cst_30 = arith.constant 9.99999974E-6 : f32
    %66 = vector.broadcast %cst_30 : f32 to vector<16x1xf32>
    %67 = arith.addf %63, %66 : vector<16x1xf32>
    %68 = math.rsqrt %67 : vector<16x1xf32>
    %69 = vector.broadcast %68 : vector<16x1xf32> to vector<16x128xf32>
    %70 = arith.mulf %65, %69 : vector<16x128xf32>
    %71 = vector.broadcast %6 : vector<1x128xf32> to vector<16x128xf32>
    %72 = arith.mulf %70, %71 : vector<16x128xf32>
    %73 = vector.broadcast %7 : vector<1x128xf32> to vector<16x128xf32>
    %74 = arith.addf %72, %73 : vector<16x128xf32>
    %75 = arith.truncf %74 : vector<16x128xf32> to vector<16x128xbf16>
    %c0_31 = arith.constant 0 : index
    %c0_32 = arith.constant 0 : index
    %76 = vector.load %arg5[%c0_31, %c0_32] : memref<128x32xbf16, #tpu.memory_space<vmem>>, vector<128x32xbf16>
    %cst_33 = arith.constant dense<0.000000e+00> : vector<16x32xf32>
    %77 = tpu.matmul %75, %76, %cst_33 {dimension_numbers = #tpu.dot_dimension_numbers<[1], [0], [0], [1], [0, 0, 1, 1], [], []>} : vector<16x128xbf16>, vector<128x32xbf16>, vector<16x32xf32> -> vector<16x32xf32>
    %c0_34 = arith.constant 0 : index
    %c0_35 = arith.constant 0 : index
    %78 = vector.load %arg7[%c0_34, %c0_35] : memref<1x32xf32, #tpu.memory_space<vmem>>, vector<1x32xf32>
    %79 = vector.broadcast %78 : vector<1x32xf32> to vector<16x32xf32>
    %80 = arith.addf %77, %79 : vector<16x32xf32>
    %81 = arith.addf %80, %0 : vector<16x32xf32>
    %c0_36 = arith.constant 0 : index
    %c0_37 = arith.constant 0 : index
    %82 = vector.load %arg8[%c0_36, %c0_37] : memref<16x32xf32, #tpu.memory_space<vmem>>, vector<16x32xf32>
    tpu.vector_store %arg8[%c0_36, %c0_37], %81 {strides = array<i32>} : memref<16x32xf32, #tpu.memory_space<vmem>>, vector<16x32xf32>,
    return
  }
  func.func @transform_0(%arg0: i32) -> (i32, i32) {
    %c0_i32 = arith.constant 0 : i32
    %c0_i32_0 = arith.constant 0 : i32
    return %arg0, %c0_i32 : i32, i32
  }
  func.func @transform_1(%arg0: i32) -> (i32, i32) {
    %c0_i32 = arith.constant 0 : i32
    %c0_i32_0 = arith.constant 0 : i32
    %c0_i32_1 = arith.constant 0 : i32
    return %c0_i32, %c0_i32_0 : i32, i32
  }
  func.func @transform_2(%arg0: i32) -> (i32, i32) {
    %c0_i32 = arith.constant 0 : i32
    %c0_i32_0 = arith.constant 0 : i32
    %c0_i32_1 = arith.constant 0 : i32
    return %c0_i32, %c0_i32_0 : i32, i32
  }
  func.func @transform_3(%arg0: i32) -> (i32, i32) {
    %c0_i32 = arith.constant 0 : i32
    %c0_i32_0 = arith.constant 0 : i32
    %c0_i32_1 = arith.constant 0 : i32
    return %c0_i32, %c0_i32_0 : i32, i32
  }
  func.func @transform_4(%arg0: i32) -> (i32, i32) {
    %c0_i32 = arith.constant 0 : i32
    %c0_i32_0 = arith.constant 0 : i32
    %c0_i32_1 = arith.constant 0 : i32
    return %c0_i32, %c0_i32_0 : i32, i32
  }
  func.func @transform_5(%arg0: i32) -> (i32, i32) {
    %c0_i32 = arith.constant 0 : i32
    %c0_i32_0 = arith.constant 0 : i32
    %c0_i32_1 = arith.constant 0 : i32
    return %c0_i32, %c0_i32_0 : i32, i32
  }
  func.func @transform_6(%arg0: i32) -> (i32, i32) {
    %c0_i32 = arith.constant 0 : i32
    %c0_i32_0 = arith.constant 0 : i32
    %c0_i32_1 = arith.constant 0 : i32
    return %c0_i32, %c0_i32_0 : i32, i32
  }
  func.func @transform_7(%arg0: i32) -> (i32, i32) {
    %c0_i32 = arith.constant 0 : i32
    %c0_i32_0 = arith.constant 0 : i32
    return %arg0, %c0_i32 : i32, i32
  }
}

module attributes {stable_mosaic.version = 11 : i64} {
  func.func @resblock_kernel(%arg0: i32, %arg1: memref<16x32xf32, #tpu.memory_space<vmem>>, %arg2: memref<32x128xbf16, #tpu.memory_space<vmem>>, %arg3: memref<128x128xbf16, #tpu.memory_space<vmem>>, %arg4: memref<128x128xbf16, #tpu.memory_space<vmem>>, %arg5: memref<128x32xbf16, #tpu.memory_space<vmem>>, %arg6: memref<8x128xf32, #tpu.memory_space<vmem>>, %arg7: memref<1x32xf32, #tpu.memory_space<vmem>>, %arg8: memref<16x32xf32, #tpu.memory_space<vmem>>) attributes {dimension_semantics = [#tpu.dimension_semantics<parallel>], iteration_bounds = array<i64: 1>, scalar_prefetch = 0 : i64, scratch_operands = 0 : i64, tpu.core_type = #tpu.core_type<tc>, window_params = [{transform_indices = @transform_0, window_bounds = array<i64: 16, 32>}, {pipeline_mode = #tpu.pipeline_mode<synchronous>, transform_indices = @transform_1, window_bounds = array<i64: 32, 128>}, {pipeline_mode = #tpu.pipeline_mode<synchronous>, transform_indices = @transform_2, window_bounds = array<i64: 128, 128>}, {pipeline_mode = #tpu.pipeline_mode<synchronous>, transform_indices = @transform_3, window_bounds = array<i64: 128, 128>}, {pipeline_mode = #tpu.pipeline_mode<synchronous>, transform_indices = @transform_4, window_bounds = array<i64: 128, 32>}, {pipeline_mode = #tpu.pipeline_mode<synchronous>, transform_indices = @transform_5, window_bounds = array<i64: 8, 128>}, {pipeline_mode = #tpu.pipeline_mode<synchronous>, transform_indices = @transform_6, window_bounds = array<i64: 1, 32>}, {transform_indices = @transform_7, window_bounds = array<i64: 16, 32>}]} {
    %c0 = arith.constant 0 : index
    %c0_0 = arith.constant 0 : index
    %0 = vector.load %arg1[%c0, %c0_0] : memref<16x32xf32, #tpu.memory_space<vmem>>, vector<16x32xf32>
    %c0_1 = arith.constant 0 : index
    %c0_2 = arith.constant 0 : index
    %1 = vector.load %arg6[%c0_1, %c0_2] : memref<8x128xf32, #tpu.memory_space<vmem>>, vector<1x128xf32>
    %c1 = arith.constant 1 : index
    %c0_3 = arith.constant 0 : index
    %2 = vector.load %arg6[%c1, %c0_3] : memref<8x128xf32, #tpu.memory_space<vmem>>, vector<1x128xf32>
    %c2 = arith.constant 2 : index
    %c0_4 = arith.constant 0 : index
    %3 = vector.load %arg6[%c2, %c0_4] : memref<8x128xf32, #tpu.memory_space<vmem>>, vector<1x128xf32>
    %c3 = arith.constant 3 : index
    %c0_5 = arith.constant 0 : index
    %4 = vector.load %arg6[%c3, %c0_5] : memref<8x128xf32, #tpu.memory_space<vmem>>, vector<1x128xf32>
    %c4 = arith.constant 4 : index
    %c0_6 = arith.constant 0 : index
    %5 = vector.load %arg6[%c4, %c0_6] : memref<8x128xf32, #tpu.memory_space<vmem>>, vector<1x128xf32>
    %c5 = arith.constant 5 : index
    %c0_7 = arith.constant 0 : index
    %6 = vector.load %arg6[%c5, %c0_7] : memref<8x128xf32, #tpu.memory_space<vmem>>, vector<1x128xf32>
    %c6 = arith.constant 6 : index
    %c0_8 = arith.constant 0 : index
    %7 = vector.load %arg6[%c6, %c0_8] : memref<8x128xf32, #tpu.memory_space<vmem>>, vector<1x128xf32>
    %8 = arith.truncf %0 : vector<16x32xf32> to vector<16x32xbf16>
    %c0_9 = arith.constant 0 : index
    %c0_10 = arith.constant 0 : index
    %9 = vector.load %arg2[%c0_9, %c0_10] : memref<32x128xbf16, #tpu.memory_space<vmem>>, vector<32x128xbf16>
    %cst = arith.constant dense<0.000000e+00> : vector<16x128xf32>
    %10 = tpu.matmul %8, %9, %cst {dimension_numbers = #tpu.dot_dimension_numbers<[1], [0], [0], [1], [0, 0, 1, 1], [], []>} : vector<16x32xbf16>, vector<32x128xbf16>, vector<16x128xf32> -> vector<16x128xf32>
    %11 = vector.broadcast %1 : vector<1x128xf32> to vector<16x128xf32>
    %12 = arith.addf %10, %11 : vector<16x128xf32>
    %cst_11 = arith.constant 0.000000e+00 : f32
    %13 = vector.broadcast %cst_11 : f32 to vector<16x128xf32>
    %14 = arith.maximumf %12, %13 : vector<16x128xf32>
    %cst_12 = arith.constant dense<0.000000e+00> : vector<16xf32>
    %15 = vector.multi_reduction <add>, %14, %cst_12 [1] : vector<16x128xf32> to vector<16xf32>
    %16 = vector.shape_cast %15 : vector<16xf32> to vector<16x1xf32>
    %17 = arith.mulf %14, %14 : vector<16x128xf32>
    %cst_13 = arith.constant dense<0.000000e+00> : vector<16xf32>
    %18 = vector.multi_reduction <add>, %17, %cst_13 [1] : vector<16x128xf32> to vector<16xf32>
    %19 = vector.shape_cast %18 : vector<16xf32> to vector<16x1xf32>
    %cst_14 = arith.constant 1.562500e-02 : f32
    %20 = vector.broadcast %cst_14 : f32 to vector<16x1xf32>
    %21 = arith.mulf %16, %20 : vector<16x1xf32>
    %cst_15 = arith.constant 1.562500e-02 : f32
    %22 = vector.broadcast %cst_15 : f32 to vector<16x1xf32>
    %23 = arith.mulf %19, %22 : vector<16x1xf32>
    %24 = arith.mulf %21, %21 : vector<16x1xf32>
    %25 = arith.subf %23, %24 : vector<16x1xf32>
    %cst_16 = arith.constant 0.000000e+00 : f32
    %26 = vector.broadcast %cst_16 : f32 to vector<16x1xf32>
    %27 = arith.maximumf %25, %26 : vector<16x1xf32>
    %28 = vector.broadcast %21 : vector<16x1xf32> to vector<16x128xf32>
    %29 = arith.subf %14, %28 : vector<16x128xf32>
    %cst_17 = arith.constant 9.99999974E-6 : f32
    %30 = vector.broadcast %cst_17 : f32 to vector<16x1xf32>
    %31 = arith.addf %27, %30 : vector<16x1xf32>
    %32 = math.rsqrt %31 : vector<16x1xf32>
    %33 = vector.broadcast %32 : vector<16x1xf32> to vector<16x128xf32>
    %34 = arith.mulf %29, %33 : vector<16x128xf32>
    %35 = vector.broadcast %2 : vector<1x128xf32> to vector<16x128xf32>
    %36 = arith.mulf %34, %35 : vector<16x128xf32>
    %37 = vector.broadcast %3 : vector<1x128xf32> to vector<16x128xf32>
    %38 = arith.addf %36, %37 : vector<16x128xf32>
    %39 = arith.truncf %38 : vector<16x128xf32> to vector<16x128xbf16>
    %c0_18 = arith.constant 0 : index
    %c0_19 = arith.constant 0 : index
    %40 = vector.load %arg3[%c0_18, %c0_19] : memref<128x128xbf16, #tpu.memory_space<vmem>>, vector<128x128xbf16>
    %cst_20 = arith.constant dense<0.000000e+00> : vector<16x128xf32>
    %41 = tpu.matmul %39, %40, %cst_20 {dimension_numbers = #tpu.dot_dimension_numbers<[1], [0], [0], [1], [0, 0, 1, 1], [], []>} : vector<16x128xbf16>, vector<128x128xbf16>, vector<16x128xf32> -> vector<16x128xf32>
    %42 = vector.broadcast %4 : vector<1x128xf32> to vector<16x128xf32>
    %43 = arith.addf %41, %42 : vector<16x128xf32>
    %44 = arith.truncf %43 : vector<16x128xf32> to vector<16x128xbf16>
    %c0_21 = arith.constant 0 : index
    %c0_22 = arith.constant 0 : index
    %45 = vector.load %arg4[%c0_21, %c0_22] : memref<128x128xbf16, #tpu.memory_space<vmem>>, vector<128x128xbf16>
    %cst_23 = arith.constant dense<0.000000e+00> : vector<16x128xf32>
    %46 = tpu.matmul %44, %45, %cst_23 {dimension_numbers = #tpu.dot_dimension_numbers<[1], [0], [0], [1], [0, 0, 1, 1], [], []>} : vector<16x128xbf16>, vector<128x128xbf16>, vector<16x128xf32> -> vector<16x128xf32>
    %47 = vector.broadcast %5 : vector<1x128xf32> to vector<16x128xf32>
    %48 = arith.addf %46, %47 : vector<16x128xf32>
    %cst_24 = arith.constant 0.000000e+00 : f32
    %49 = vector.broadcast %cst_24 : f32 to vector<16x128xf32>
    %50 = arith.maximumf %48, %49 : vector<16x128xf32>
    %cst_25 = arith.constant dense<0.000000e+00> : vector<16xf32>
    %51 = vector.multi_reduction <add>, %50, %cst_25 [1] : vector<16x128xf32> to vector<16xf32>
    %52 = vector.shape_cast %51 : vector<16xf32> to vector<16x1xf32>
    %53 = arith.mulf %50, %50 : vector<16x128xf32>
    %cst_26 = arith.constant dense<0.000000e+00> : vector<16xf32>
    %54 = vector.multi_reduction <add>, %53, %cst_26 [1] : vector<16x128xf32> to vector<16xf32>
    %55 = vector.shape_cast %54 : vector<16xf32> to vector<16x1xf32>
    %cst_27 = arith.constant 1.562500e-02 : f32
    %56 = vector.broadcast %cst_27 : f32 to vector<16x1xf32>
    %57 = arith.mulf %52, %56 : vector<16x1xf32>
    %cst_28 = arith.constant 1.562500e-02 : f32
    %58 = vector.broadcast %cst_28 : f32 to vector<16x1xf32>
    %59 = arith.mulf %55, %58 : vector<16x1xf32>
    %60 = arith.mulf %57, %57 : vector<16x1xf32>
    %61 = arith.subf %59, %60 : vector<16x1xf32>
    %cst_29 = arith.constant 0.000000e+00 : f32
    %62 = vector.broadcast %cst_29 : f32 to vector<16x1xf32>
    %63 = arith.maximumf %61, %62 : vector<16x1xf32>
    %64 = vector.broadcast %57 : vector<16x1xf32> to vector<16x128xf32>
    %65 = arith.subf %50, %64 : vector<16x128xf32>
    %cst_30 = arith.constant 9.99999974E-6 : f32
    %66 = vector.broadcast %cst_30 : f32 to vector<16x1xf32>
    %67 = arith.addf %63, %66 : vector<16x1xf32>
    %68 = math.rsqrt %67 : vector<16x1xf32>
    %69 = vector.broadcast %68 : vector<16x1xf32> to vector<16x128xf32>
    %70 = arith.mulf %65, %69 : vector<16x128xf32>
    %71 = vector.broadcast %6 : vector<1x128xf32> to vector<16x128xf32>
    %72 = arith.mulf %70, %71 : vector<16x128xf32>
    %73 = vector.broadcast %7 : vector<1x128xf32> to vector<16x128xf32>
    %74 = arith.addf %72, %73 : vector<16x128xf32>
    %75 = arith.truncf %74 : vector<16x128xf32> to vector<16x128xbf16>
    %c0_31 = arith.constant 0 : index
    %c0_32 = arith.constant 0 : index
    %76 = vector.load %arg5[%c0_31, %c0_32] : memref<128x32xbf16, #tpu.memory_space<vmem>>, vector<128x32xbf16>
    %cst_33 = arith.constant dense<0.000000e+00> : vector<16x32xf32>
    %77 = tpu.matmul %75, %76, %cst_33 {dimension_numbers = #tpu.dot_dimension_numbers<[1], [0], [0], [1], [0, 0, 1, 1], [], []>} : vector<16x128xbf16>, vector<128x32xbf16>, vector<16x32xf32> -> vector<16x32xf32>
    %c0_34 = arith.constant 0 : index
    %c0_35 = arith.constant 0 : index
    %78 = vector.load %arg7[%c0_34, %c0_35] : memref<1x32xf32, #tpu.memory_space<vmem>>, vector<1x32xf32>
    %79 = vector.broadcast %78 : vector<1x32xf32> to vector<16x32xf32>
    %80 = arith.addf %77, %79 : vector<16x32xf32>
    %81 = arith.addf %80, %0 : vector<16x32xf32>
    %c0_36 = arith.constant 0 : index
    %c0_37 = arith.constant 0 : index
    %82 = vector.load %arg8[%c0_36, %c0_37] : memref<16x32xf32, #tpu.memory_space<vmem>>, vector<16x32xf32>
    tpu.vector_store %arg8[%c0_36, %c0_37], %81 {strides = array<i32>} : memref<16x32xf32, #tpu.memory_space<vmem>>, vector<16x32xf32>,
    return
  }
  func.func @transform_0(%arg0: i32) -> (i32, i32) {
    %c0_i32 = arith.constant 0 : i32
    %c0_i32_0 = arith.constant 0 : i32
    return %arg0, %c0_i32 : i32, i32
  }
  func.func @transform_1(%arg0: i32) -> (i32, i32) {
    %c0_i32 = arith.constant 0 : i32
    %c0_i32_0 = arith.constant 0 : i32
    %c0_i32_1 = arith.constant 0 : i32
    return %c0_i32, %c0_i32_0 : i32, i32
  }
  func.func @transform_2(%arg0: i32) -> (i32, i32) {
    %c0_i32 = arith.constant 0 : i32
    %c0_i32_0 = arith.constant 0 : i32
    %c0_i32_1 = arith.constant 0 : i32
    return %c0_i32, %c0_i32_0 : i32, i32
  }
  func.func @transform_3(%arg0: i32) -> (i32, i32) {
    %c0_i32 = arith.constant 0 : i32
    %c0_i32_0 = arith.constant 0 : i32
    %c0_i32_1 = arith.constant 0 : i32
    return %c0_i32, %c0_i32_0 : i32, i32
  }
  func.func @transform_4(%arg0: i32) -> (i32, i32) {
    %c0_i32 = arith.constant 0 : i32
    %c0_i32_0 = arith.constant 0 : i32
    %c0_i32_1 = arith.constant 0 : i32
    return %c0_i32, %c0_i32_0 : i32, i32
  }
  func.func @transform_5(%arg0: i32) -> (i32, i32) {
    %c0_i32 = arith.constant 0 : i32
    %c0_i32_0 = arith.constant 0 : i32
    %c0_i32_1 = arith.constant 0 : i32
    return %c0_i32, %c0_i32_0 : i32, i32
  }
  func.func @transform_6(%arg0: i32) -> (i32, i32) {
    %c0_i32 = arith.constant 0 : i32
    %c0_i32_0 = arith.constant 0 : i32
    %c0_i32_1 = arith.constant 0 : i32
    return %c0_i32, %c0_i32_0 : i32, i32
  }
  func.func @transform_7(%arg0: i32) -> (i32, i32) {
    %c0_i32 = arith.constant 0 : i32
    %c0_i32_0 = arith.constant 0 : i32
    return %arg0, %c0_i32 : i32, i32
  }
}

</mosaic_0001>

<bundles_post_ra>
// kernel: tpu_custom_call.1
= control target key start
LH: loop header
LB: loop body
LE: loop exit
PB: predicated region body
PF: predicated region fallthrough
CT: control target
= control target key end

     0   :  { %12 = vsyncpa [#allocation3], 0  ;;  %s1038_s0 = inlined_call_operand.vmem [shape: f32[16,32], index: 0, kind: input, shape index: {}]   ;;  %s1039_s1 = inlined_call_operand.hbm [shape: bf16[32,128], index: 1, kind: input, shape index: {}]   ;;  %s1040_s2 = inlined_call_operand.vmem [shape: bf16[128,128], index: 2, kind: input, shape index: {}]   ;;  %s1041_s3 = inlined_call_operand.hbm [shape: bf16[128,128], index: 3, kind: input, shape index: {}]   ;;  %s1042_s4 = inlined_call_operand.vmem [shape: bf16[128,32], index: 4, kind: input, shape index: {}]   ;;  %s1043_s5 = inlined_call_operand.vmem [shape: f32[8,128], index: 5, kind: input, shape index: {}]   ;;  %s1044_s6 = inlined_call_operand.vmem [shape: f32[1,32], index: 6, kind: input, shape index: {}]   ;;  %s1045_s7 = inlined_call_operand.hbm [shape: f32[16,32], index: 7, kind: output, shape index: {}]  }
   0x1   :  { %13 = vsyncpa [#allocation6], 0 }
   0x2   :  { %14 = vsyncpa [#allocation4], 0  ;;  %s818_s24 = smov [#allocation2]   ;;  %s746_s28 = scalar_lea.hbm %s1039_s1, 256 }
   0x3   :  { %s22_s25 = sshll.u32 %s818_s24, 4  ;;  %p747_p0 = scmp.ne.s32.totalorder %s1039_s1, %s746_s28  ;;  %s23_s25 = int_to_ptr.vmem [resolvable:$true] %s22_s25 }
   0x4   :  { %p750_p1 = scmp.lt.u32.totalorder %s746_s28, %s1039_s1 }
   0x6   :  { %p752_p2 = pnand %p750_p1, %p747_p0 }
   0x8   :  { %755 = shalt.err (!%p752_p2)
}
   0x9   :  { %s756_s10 = scalar_lea.vmem %s23_s25, 256  ;;  %p761_p4 = scmp.lt.s32.totalorder %s23_s25, %s23_s25 }
   0xa   :  { %p757_p3 = scmp.ne.s32.totalorder %s23_s25, %s756_s10  ;;  %p762_p5 = scmp.lt.s32.totalorder %s756_s10, %s756_s10 }
   0xc   :  { %p763_p6 = por %p762_p5, %p761_p4 }
   0xe   :  { %p764_p7 = pnand %p763_p6, %p757_p3 }
  0x10   :  { %767 = shalt.err (!%p764_p7)
}
  0x11   :  { %s819_s11 = smov 64   ;;  %s820_s12 = smov 4  }
  0x12   :  { %28 = dma.hbm_to_vmem [thread:$0]  %s1039_s1, 256, %s23_s25, [#allocation3], %s819_s11, %s819_s11, %s820_s12  }
  0x13   :  { %s821_s15 = smov [#allocation5]   ;;  %s768_s19 = scalar_lea.hbm %s1041_s3, 1024 }
  0x14   :  { %s36_s16 = sshll.u32 %s821_s15, 4  ;;  %p769_p8 = scmp.ne.s32.totalorder %s1041_s3, %s768_s19  ;;  %s37_s16 = int_to_ptr.vmem [resolvable:$true] %s36_s16 }
  0x15   :  { %p772_p9 = scmp.lt.u32.totalorder %s768_s19, %s1041_s3 }
  0x17   :  { %p774_p10 = pnand %p772_p9, %p769_p8 }
  0x19   :  { %777 = shalt.err (!%p774_p10)
}
  0x1a   :  { %s778_s24 = scalar_lea.vmem %s37_s16, 1024  ;;  %p783_p12 = scmp.lt.s32.totalorder %s37_s16, %s37_s16 }
  0x1b   :  { %p779_p11 = scmp.ne.s32.totalorder %s37_s16, %s778_s24  ;;  %p784_p13 = scmp.lt.s32.totalorder %s778_s24, %s778_s24 }
  0x1d   :  { %p785_p0 = por %p784_p13, %p783_p12 }
  0x1f   :  { %p786_p1 = pnand %p785_p0, %p779_p11 }
  0x21   :  { %789 = shalt.err (!%p786_p1)
}
  0x22   :  { %42 = dma.hbm_to_vmem [thread:$0]  %s1041_s3, 1024, %s37_s16, [#allocation6], %s819_s11, %s819_s11, %s820_s12  }
  0x23   :  { %812 = dma.done.wait [#allocation3], 256  }
  0x24   :  { %813 = vsyncadd [#allocation3], 4294967040 }
  0x25   :  { %814 = dma.done.wait [#allocation6], 1024  }
  0x26   :  { %815 = vsyncadd [#allocation6], 4294966272  ;;  %v822_v0 = vmov 0.0   ;;  %vm823_vm0 = vmmov 0   ;;  %v712_v1 = vld [vmem:[#allocation2] sm:$0xff]   ;;  %v713_v2 = vld [vmem:[#allocation2 + $0x8] sm:$0xff]  }
  0x27   :  { %635 = vmatprep.subr.bf16.mxu0 %v822_v0  ;;  %639 = vmatprep.mubr.msk.bf16.mxu0 %vm823_vm0, %v822_v0  ;;  %v900_v3 = vld [vmem:[%s1038_s0] sm:$0xff]  ;;  %v905_v4 = vld [vmem:[%s1038_s0 + $0x8] sm:$0xff]  ;;  %vm86_vm1 = vcmask 261120   ;;  %v716_v19 = vld [vmem:[%s1040_s2 + $0x10] sm:$0xff]   ;;  %s824_s24 = smov [#allocation7]  }
  0x28   :  { %643 = vmatprep.subr.bf16.mxu1 %v822_v0  ;;  %659 = vmatprep.mubr.msk.bf16.mxu1 %vm823_vm0, %v822_v0  ;;  %v65_v5 = vpack.c.bf16 %v905_v4, %v900_v3  ;;  %v570_v6 = vld [vmem:[%s1043_s5] ss:$0 sm:$0xff]  ;;  %v715_v18 = vld [vmem:[%s1040_s2 + $0x8] sm:$0xff]   ;;  %v717_v20 = vld [vmem:[%s1040_s2 + $0x18] sm:$0xff]   ;;  %s557_s1 = sshll.u32 %s824_s24, 4  ;;  %s558_s1 = int_to_ptr.vmem [resolvable:$true] %s557_s1 }
  0x29   :  { %636 = vmatpush3.bf16.msra.mxu0 %v712_v1  ;;  %v714_v17 = vld [vmem:[%s1040_s2] sm:$0xff]   ;;  %v719_v22 = vld [vmem:[%s1040_s2 + $0x28] sm:$0xff]   ;;  %v720_v23 = vld [vmem:[%s1040_s2 + $0x30] sm:$0xff]   ;;  %p795_p3 = scmp.lt.s32.totalorder %s558_s1, %s558_s1 }
  0x2a   :  { %637 = vmatprep.subr.bf16.mxu0 %v822_v0  ;;  %644 = vmatpush3.bf16.msra.mxu1 %v714_v17  ;;  %v718_v21 = vld [vmem:[%s1040_s2 + $0x20] sm:$0xff]   ;;  %v721_v24 = vld [vmem:[%s1040_s2 + $0x38] sm:$0xff]   ;;  %v722_v25 = vld [vmem:[#allocation5] sm:$0xff]  }
  0x2b   :  { %645 = vmatprep.subr.bf16.mxu1 %v822_v0  ;;  %v723_v26 = vld [vmem:[#allocation5 + $0x8] sm:$0xff]   ;;  %v724_v27 = vld [vmem:[#allocation5 + $0x10] sm:$0xff]   ;;  %v725_v28 = vld [vmem:[#allocation5 + $0x18] sm:$0xff]  }
  0x2c   :  { %v726_v29 = vld [vmem:[#allocation5 + $0x20] sm:$0xff]   ;;  %v727_v30 = vld [vmem:[#allocation5 + $0x28] sm:$0xff]   ;;  %v574_v50 = vld [vmem:[%s1043_s5 + $0x1] ss:$0 sm:$0xff] }
  0x2d   :  { %638 = vmatpush3.bf16.msra.mxu0 %v713_v2  ;;  %v575_v55 = vld [vmem:[%s1043_s5 + $0x2] ss:$0 sm:$0xff]  ;;  %v729_v61 = vld [vmem:[#allocation5 + $0x38] sm:$0xff]   ;;  %v576_v62 = vld [vmem:[%s1043_s5 + $0x3] ss:$0 sm:$0xff] }
  0x2e   :  { %663 = vmatprep.subr.bf16.mxu0 %v822_v0  ;;  %646 = vmatpush3.bf16.msra.mxu1 %v715_v18  ;;  %v728_v60 = vld [vmem:[#allocation5 + $0x30] sm:$0xff]  }
  0x2f   :  { %647 = vmatprep.subr.bf16.mxu1 %v822_v0 }
  0x30   :  { %640 = vmatmul.mubr.msk.bf16.vlgmr.msra.gmra.mrb[0].mxu0 %vm86_vm1, %v65_v5 }
  0x31   :  { %679 = vmatprep.mubr.msk.bf16.mxu0 %vm823_vm0, %v822_v0  ;;  %664 = vmatpush3.bf16.msra.mxu0 %v722_v25  ;;  %v735_v25 = vld [vmem:[%s1042_s4 + $0x28] sm:$0xff]  }
  0x32   :  { %648 = vmatpush3.bf16.msra.mxu1 %v716_v19  ;;  %665 = vmatprep.subr.bf16.mxu0 %v822_v0 }
  0x33   :  { %649 = vmatprep.subr.bf16.mxu1 %v822_v0 }
  0x35   :  { %666 = vmatpush3.bf16.msra.mxu0 %v723_v26  ;;  %v736_v26 = vld [vmem:[%s1042_s4 + $0x30] sm:$0xff]  }
  0x36   :  { %650 = vmatpush3.bf16.msra.mxu1 %v717_v20  ;;  %667 = vmatprep.subr.bf16.mxu0 %v822_v0  ;;  %v730_v20 = vld [vmem:[%s1042_s4] sm:$0xff]  }
  0x37   :  { %651 = vmatprep.subr.bf16.mxu1 %v822_v0 }
  0x39   :  { %668 = vmatpush3.bf16.msra.mxu0 %v724_v27  ;;  %v737_v27 = vld [vmem:[%s1042_s4 + $0x38] sm:$0xff]  }
  0x3a   :  { %652 = vmatpush3.bf16.msra.mxu1 %v718_v21  ;;  %669 = vmatprep.subr.bf16.mxu0 %v822_v0  ;;  %v731_v21 = vld [vmem:[%s1042_s4 + $0x8] sm:$0xff]  }
  0x3b   :  { %653 = vmatprep.subr.bf16.mxu1 %v822_v0 }
  0x3d   :  { %670 = vmatpush3.bf16.msra.mxu0 %v725_v28 }
  0x3e   :  { %654 = vmatpush3.bf16.msra.mxu1 %v719_v22  ;;  %671 = vmatprep.subr.bf16.mxu0 %v822_v0  ;;  %v732_v22 = vld [vmem:[%s1042_s4 + $0x10] sm:$0xff]  }
  0x3f   :  { %655 = vmatprep.subr.bf16.mxu1 %v822_v0 }
  0x41   :  { %672 = vmatpush3.bf16.msra.mxu0 %v726_v29 }
  0x42   :  { %656 = vmatpush3.bf16.msra.mxu1 %v720_v23  ;;  %673 = vmatprep.subr.bf16.mxu0 %v822_v0  ;;  %v733_v23 = vld [vmem:[%s1042_s4 + $0x18] sm:$0xff]  }
  0x43   :  { %657 = vmatprep.subr.bf16.mxu1 %v822_v0 }
  0x45   :  { %674 = vmatpush3.bf16.msra.mxu0 %v727_v30 }
  0x46   :  { %658 = vmatpush3.bf16.msra.mxu1 %v721_v24  ;;  %675 = vmatprep.subr.bf16.mxu0 %v822_v0  ;;  %v734_v24 = vld [vmem:[%s1042_s4 + $0x20] sm:$0xff]  }
  0x47   :  { %683 = vmatprep.subr.bf16.mxu1 %v822_v0 }
  0x49   :  { %676 = vmatpush3.bf16.msra.mxu0 %v728_v60 }
  0x4a   :  { %677 = vmatprep.subr.bf16.mxu0 %v822_v0 }
  0x4d   :  { %678 = vmatpush3.bf16.msra.mxu0 %v729_v61 }
 0x103   :  { %v124_v7 = vpop.f32.mrb[0].mxu0 }
 0x104   :  { %v125_v8 = vadd.f32 %v570_v6, %v124_v7  ;;  %v641_v9 = vpop.f32.mrb[1].mxu0 }
 0x105   :  { %v127_v10 = vpop.f32.mrb[2].mxu0  ;;  %v585_v9 = vld [vmem:[%s1043_s5 + $0x4] ss:$0 sm:$0xff] }
 0x106   :  { %v917_v11 = vmax.f32 %v125_v8, 0.0  ;;  %v128_v12 = vadd.f32 %v570_v6, %v127_v10  ;;  %v642_v13 = vpop.f32.mrb[3].mxu0 }
 0x108   :  { %v919_v14 = vmax.f32 %v128_v12, 0.0  ;;  %133 = vadd.xlane.f32.xlu0 %v917_v11  ;;  %v137_v15 = vmul.f32 %v917_v11, %v917_v11 }
 0x10a   :  { %139 = vadd.xlane.f32.xlu1 %v137_v15  ;;  %v138_v16 = vmul.f32 %v919_v14, %v919_v14 }
 0x10c   :  { %135 = vadd.xlane.f32.xlu0 %v919_v14 }
 0x10e   :  { %141 = vadd.xlane.f32.xlu1 %v138_v16 }
 0x195   :  { %v134_v31 = vpop.xlane.xlu0 %133 }
 0x196   :  { %v143_v32 = vmul.f32 0.015625, %v134_v31 }
 0x197   :  { %v140_v33 = vpop.xlane.xlu1 %139 }
 0x198   :  { %v147_v34 = vmul.f32 %v143_v32, %v143_v32  ;;  %v145_v35 = vmul.f32 0.015625, %v140_v33  ;;  %v153_v47 = vsub.f32 %v917_v11, %v143_v32 }
 0x199   :  { %v136_v36 = vpop.xlane.xlu0 %135 }
 0x19a   :  { %v149_v37 = vsub.f32 %v145_v35, %v147_v34  ;;  %v144_v38 = vmul.f32 0.015625, %v136_v36 }
 0x19b   :  { %v142_v39 = vpop.xlane.xlu1 %141 }
 0x19c   :  { %v151_v40 = vmax.f32 %v149_v37, 0.0  ;;  %v148_v41 = vmul.f32 %v144_v38, %v144_v38  ;;  %v146_v42 = vmul.f32 0.015625, %v142_v39  ;;  %v154_v51 = vsub.f32 %v919_v14, %v144_v38 }
 0x19e   :  { %v155_v43 = vadd.f32 1e-05, %v151_v40  ;;  %v150_v44 = vsub.f32 %v146_v42, %v148_v41 }
 0x1a0   :  { %738 = vrsqrt.f32 %v155_v43  ;;  %v152_v45 = vmax.f32 %v150_v44, 0.0 }
 0x1a2   :  { %v156_v46 = vadd.f32 1e-05, %v152_v45  ;;  %v594_v45 = vld [vmem:[%s1043_s5 + $0x5] ss:$0 sm:$0xff] }
 0x1a4   :  { %740 = vrsqrt.f32 %v156_v46 }
 0x1aa   :  { %v739_v48 = vpop.eup %738 }
 0x1ab   :  { %v159_v49 = vmul.f32 %v739_v48, %v153_v47 }
 0x1ad   :  { %v165_v54 = vmul.f32 %v574_v50, %v159_v49 }
 0x1ae   :  { %v741_v52 = vpop.eup %740 }
 0x1af   :  { %v160_v53 = vmul.f32 %v741_v52, %v154_v51  ;;  %v171_v57 = vadd.f32 %v575_v55, %v165_v54  ;;  %v595_v51 = vld [vmem:[%s1043_s5 + $0x6] ss:$0 sm:$0xff]  ;;  %s790_s5 = scalar_lea.vmem %s558_s1, 256 }
 0x1b0   :  { %p791_p2 = scmp.ne.s32.totalorder %s558_s1, %s790_s5  ;;  %p796_p4 = scmp.lt.s32.totalorder %s790_s5, %s790_s5 }
 0x1b1   :  { %v166_v56 = vmul.f32 %v574_v50, %v160_v53 }
 0x1b2   :  { %p797_p5 = por %p796_p4, %p795_p3 }
 0x1b3   :  { %v172_v58 = vadd.f32 %v575_v55, %v166_v56  ;;  %v596_v56 = vld [vmem:[%s1044_s6] ss:$0 sm:$0xff] }
 0x1b4   :  { %p798_p6 = pnand %p797_p5, %p791_p2 }
 0x1b5   :  { %v173_v59 = vpack.c.bf16 %v172_v58, %v171_v57 }
 0x1b7   :  { %660 = vmatmul.mubr.bf16.vlgmr.msra.gmra.mrb[0].mxu1 %v173_v59 }
 0x1b8   :  { %699 = vmatprep.mubr.msk.bf16.mxu1 %vm823_vm0, %v822_v0  ;;  %684 = vmatpush3.bf16.msra.mxu1 %v730_v20 }
 0x1b9   :  { %685 = vmatprep.subr.bf16.mxu1 %v822_v0 }
 0x1bc   :  { %686 = vmatpush3.bf16.msra.mxu1 %v731_v21 }
 0x1bd   :  { %687 = vmatprep.subr.bf16.mxu1 %v822_v0 }
 0x1c0   :  { %688 = vmatpush3.bf16.msra.mxu1 %v732_v22 }
 0x1c1   :  { %689 = vmatprep.subr.bf16.mxu1 %v822_v0 }
 0x1c4   :  { %690 = vmatpush3.bf16.msra.mxu1 %v733_v23 }
 0x1c5   :  { %691 = vmatprep.subr.bf16.mxu1 %v822_v0 }
 0x1c8   :  { %692 = vmatpush3.bf16.msra.mxu1 %v734_v24 }
 0x1c9   :  { %693 = vmatprep.subr.bf16.mxu1 %v822_v0 }
 0x1cc   :  { %694 = vmatpush3.bf16.msra.mxu1 %v735_v25 }
 0x1cd   :  { %695 = vmatprep.subr.bf16.mxu1 %v822_v0 }
 0x1d0   :  { %696 = vmatpush3.bf16.msra.mxu1 %v736_v26 }
 0x1d1   :  { %697 = vmatprep.subr.bf16.mxu1 %v822_v0 }
 0x1d4   :  { %698 = vmatpush3.bf16.msra.mxu1 %v737_v27 }
 0x28a   :  { %v276_v63 = vpop.f32.mrb[0].mxu1 }
 0x28b   :  { %v661_v1 = vpop.f32.mrb[1].mxu1  ;;  %v277_v5 = vadd.f32 %v576_v62, %v276_v63 }
 0x28c   :  { %v279_v2 = vpop.f32.mrb[2].mxu1 }
 0x28d   :  { %v280_v6 = vadd.f32 %v576_v62, %v279_v2  ;;  %v662_v7 = vpop.f32.mrb[3].mxu1 }
 0x28f   :  { %v283_v8 = vpack.c.bf16 %v280_v6, %v277_v5 }
 0x291   :  { %680 = vmatmul.mubr.bf16.vlgmr.msra.gmra.mrb[4].mxu0 %v283_v8 }
 0x364   :  { %v386_v10 = vpop.f32.mrb[4].mxu0 }
 0x365   :  { %v387_v11 = vadd.f32 %v585_v9, %v386_v10  ;;  %v681_v12 = vpop.f32.mrb[5].mxu0 }
 0x366   :  { %v389_v13 = vpop.f32.mrb[6].mxu0 }
 0x367   :  { %v393_v14 = vmax.f32 %v387_v11, 0.0  ;;  %v390_v15 = vadd.f32 %v585_v9, %v389_v13  ;;  %v682_v16 = vpop.f32.mrb[7].mxu0 }
 0x369   :  { %v394_v17 = vmax.f32 %v390_v15, 0.0  ;;  %395 = vadd.xlane.f32.xlu0 %v393_v14  ;;  %v399_v18 = vmul.f32 %v393_v14, %v393_v14 }
 0x36b   :  { %397 = vadd.xlane.f32.xlu1 %v394_v17  ;;  %v400_v19 = vmul.f32 %v394_v17, %v394_v17 }
 0x36d   :  { %401 = vadd.xlane.f32.xlu0 %v399_v18 }
 0x36f   :  { %403 = vadd.xlane.f32.xlu1 %v400_v19 }
 0x3f6   :  { %v396_v28 = vpop.xlane.xlu0 %395 }
 0x3f7   :  { %v405_v29 = vmul.f32 0.015625, %v396_v28 }
 0x3f8   :  { %v398_v30 = vpop.xlane.xlu1 %397 }
 0x3f9   :  { %v406_v31 = vmul.f32 0.015625, %v398_v30  ;;  %v409_v33 = vmul.f32 %v405_v29, %v405_v29  ;;  %v415_v0 = vsub.f32 %v393_v14, %v405_v29 }
 0x3fa   :  { %v402_v32 = vpop.xlane.xlu0 %401 }
 0x3fb   :  { %v407_v34 = vmul.f32 0.015625, %v402_v32  ;;  %v410_v36 = vmul.f32 %v406_v31, %v406_v31  ;;  %v416_v46 = vsub.f32 %v394_v17, %v406_v31 }
 0x3fc   :  { %v404_v35 = vpop.xlane.xlu1 %403 }
 0x3fd   :  { %v411_v37 = vsub.f32 %v407_v34, %v409_v33  ;;  %v408_v38 = vmul.f32 0.015625, %v404_v35 }
 0x3ff   :  { %v413_v39 = vmax.f32 %v411_v37, 0.0  ;;  %v412_v40 = vsub.f32 %v408_v38, %v410_v36 }
 0x401   :  { %v417_v41 = vadd.f32 1e-05, %v413_v39  ;;  %v414_v42 = vmax.f32 %v412_v40, 0.0 }
 0x403   :  { %742 = vrsqrt.f32 %v417_v41  ;;  %v418_v43 = vadd.f32 1e-05, %v414_v42 }
 0x405   :  { %744 = vrsqrt.f32 %v418_v43 }
 0x40d   :  { %v743_v44 = vpop.eup %742 }
 0x40e   :  { %v421_v47 = vmul.f32 %v743_v44, %v415_v0 }
 0x40f   :  { %v745_v48 = vpop.eup %744 }
 0x410   :  { %v422_v49 = vmul.f32 %v745_v48, %v416_v46  ;;  %v427_v50 = vmul.f32 %v594_v45, %v421_v47 }
 0x412   :  { %v428_v52 = vmul.f32 %v594_v45, %v422_v49  ;;  %v433_v53 = vadd.f32 %v595_v51, %v427_v50 }
 0x414   :  { %v434_v54 = vadd.f32 %v595_v51, %v428_v52 }
 0x416   :  { %v435_v55 = vpack.c.bf16 %v434_v54, %v433_v53 }
 0x418   :  { %700 = vmatmul.mubr.bf16.vlgmr.msra.gmra.mrb[4].mxu1 %v435_v55 }
 0x4eb   :  { %v541_v57 = vpop.f32.mrb[4].mxu1 }
 0x4ec   :  { %v542_v58 = vadd.f32 %v596_v56, %v541_v57  ;;  %v701_v59 = vpop.f32.mrb[5].mxu1 }
 0x4ed   :  { %v544_v60 = vpop.f32.mrb[6].mxu1 }
 0x4ee   :  { %v548_v61 = vadd.f32 %v542_v58, %v900_v3  ;;  %v545_v62 = vadd.f32 %v596_v56, %v544_v60  ;;  %v702_v63 = vpop.f32.mrb[7].mxu1 }
 0x4f0   :  { %550 = vst.msk [vmem:[#allocation7] sm:$0xff] %vm86_vm1, %v548_v61  ;;  %v549_v1 = vadd.f32 %v545_v62, %v905_v4 }
 0x4f2   :  { %551 = vst.msk [vmem:[#allocation7 + $0x8] sm:$0xff] %vm86_vm1, %v549_v1 }
 0x4f3   :  { %801 = shalt.err (!%p798_p6)
}
 0x4f4   :  { %s802_s3 = scalar_lea.hbm %s1045_s7, 256 }
 0x4f5   :  { %p803_p7 = scmp.ne.s32.totalorder %s1045_s7, %s802_s3  ;;  %p806_p8 = scmp.lt.u32.totalorder %s802_s3, %s1045_s7 }
 0x4f7   :  { %p808_p9 = pnand %p806_p8, %p803_p7 }
 0x4f9   :  { %811 = shalt.err (!%p808_p9)
}
 0x4fa   :  { %s825_s30 = smov 128   ;;  %s826_s0 = smov 8  }
 0x4fb   :  { %563 = dma.vmem_to_hbm [thread:$0]  %s558_s1, 256, %s1045_s7, [#allocation4], %s825_s30, %s825_s30, %s826_s0  }
 0x4fc   :  { %816 = dma.done.wait [#allocation4], 256  }
 0x4fd   :  { %817 = vsyncadd [#allocation4], 4294967040 }
 0x4fe   :  { %567 = vsyncpa [#allocation3], 1 }
 0x4ff   :  { %568 = vsyncpa [#allocation6], 1 }
 0x500   :  { %569 = vsyncpa [#allocation4], 1 }

// kernel: tpu_custom_call.1
= control target key start
LH: loop header
LB: loop body
LE: loop exit
PB: predicated region body
PF: predicated region fallthrough
CT: control target
= control target key end

     0   :  { %12 = vsyncpa [#allocation3], 0  ;;  %s1038_s0 = inlined_call_operand.vmem [shape: f32[16,32], index: 0, kind: input, shape index: {}]   ;;  %s1039_s1 = inlined_call_operand.hbm [shape: bf16[32,128], index: 1, kind: input, shape index: {}]   ;;  %s1040_s2 = inlined_call_operand.vmem [shape: bf16[128,128], index: 2, kind: input, shape index: {}]   ;;  %s1041_s3 = inlined_call_operand.hbm [shape: bf16[128,128], index: 3, kind: input, shape index: {}]   ;;  %s1042_s4 = inlined_call_operand.vmem [shape: bf16[128,32], index: 4, kind: input, shape index: {}]   ;;  %s1043_s5 = inlined_call_operand.vmem [shape: f32[8,128], index: 5, kind: input, shape index: {}]   ;;  %s1044_s6 = inlined_call_operand.vmem [shape: f32[1,32], index: 6, kind: input, shape index: {}]   ;;  %s1045_s7 = inlined_call_operand.hbm [shape: f32[16,32], index: 7, kind: output, shape index: {}]  }
   0x1   :  { %13 = vsyncpa [#allocation6], 0 }
   0x2   :  { %14 = vsyncpa [#allocation4], 0  ;;  %s818_s24 = smov [#allocation2]   ;;  %s746_s28 = scalar_lea.hbm %s1039_s1, 256 }
   0x3   :  { %s22_s25 = sshll.u32 %s818_s24, 4  ;;  %p747_p0 = scmp.ne.s32.totalorder %s1039_s1, %s746_s28  ;;  %s23_s25 = int_to_ptr.vmem [resolvable:$true] %s22_s25 }
   0x4   :  { %p750_p1 = scmp.lt.u32.totalorder %s746_s28, %s1039_s1 }
   0x6   :  { %p752_p2 = pnand %p750_p1, %p747_p0 }
   0x8   :  { %755 = shalt.err (!%p752_p2)
}
   0x9   :  { %s756_s10 = scalar_lea.vmem %s23_s25, 256  ;;  %p761_p4 = scmp.lt.s32.totalorder %s23_s25, %s23_s25 }
   0xa   :  { %p757_p3 = scmp.ne.s32.totalorder %s23_s25, %s756_s10  ;;  %p762_p5 = scmp.lt.s32.totalorder %s756_s10, %s756_s10 }
   0xc   :  { %p763_p6 = por %p762_p5, %p761_p4 }
   0xe   :  { %p764_p7 = pnand %p763_p6, %p757_p3 }
  0x10   :  { %767 = shalt.err (!%p764_p7)
}
  0x11   :  { %s819_s11 = smov 64   ;;  %s820_s12 = smov 4  }
  0x12   :  { %28 = dma.hbm_to_vmem [thread:$0]  %s1039_s1, 256, %s23_s25, [#allocation3], %s819_s11, %s819_s11, %s820_s12  }
  0x13   :  { %s821_s15 = smov [#allocation5]   ;;  %s768_s19 = scalar_lea.hbm %s1041_s3, 1024 }
  0x14   :  { %s36_s16 = sshll.u32 %s821_s15, 4  ;;  %p769_p8 = scmp.ne.s32.totalorder %s1041_s3, %s768_s19  ;;  %s37_s16 = int_to_ptr.vmem [resolvable:$true] %s36_s16 }
  0x15   :  { %p772_p9 = scmp.lt.u32.totalorder %s768_s19, %s1041_s3 }
  0x17   :  { %p774_p10 = pnand %p772_p9, %p769_p8 }
  0x19   :  { %777 = shalt.err (!%p774_p10)
}
  0x1a   :  { %s778_s24 = scalar_lea.vmem %s37_s16, 1024  ;;  %p783_p12 = scmp.lt.s32.totalorder %s37_s16, %s37_s16 }
  0x1b   :  { %p779_p11 = scmp.ne.s32.totalorder %s37_s16, %s778_s24  ;;  %p784_p13 = scmp.lt.s32.totalorder %s778_s24, %s778_s24 }
  0x1d   :  { %p785_p0 = por %p784_p13, %p783_p12 }
  0x1f   :  { %p786_p1 = pnand %p785_p0, %p779_p11 }
  0x21   :  { %789 = shalt.err (!%p786_p1)
}
  0x22   :  { %42 = dma.hbm_to_vmem [thread:$0]  %s1041_s3, 1024, %s37_s16, [#allocation6], %s819_s11, %s819_s11, %s820_s12  }
  0x23   :  { %812 = dma.done.wait [#allocation3], 256  }
  0x24   :  { %813 = vsyncadd [#allocation3], 4294967040 }
  0x25   :  { %814 = dma.done.wait [#allocation6], 1024  }
  0x26   :  { %815 = vsyncadd [#allocation6], 4294966272  ;;  %v822_v0 = vmov 0.0   ;;  %vm823_vm0 = vmmov 0   ;;  %v712_v1 = vld [vmem:[#allocation2] sm:$0xff]   ;;  %v713_v2 = vld [vmem:[#allocation2 + $0x8] sm:$0xff]  }
  0x27   :  { %635 = vmatprep.subr.bf16.mxu0 %v822_v0  ;;  %639 = vmatprep.mubr.msk.bf16.mxu0 %vm823_vm0, %v822_v0  ;;  %v900_v3 = vld [vmem:[%s1038_s0] sm:$0xff]  ;;  %v905_v4 = vld [vmem:[%s1038_s0 + $0x8] sm:$0xff]  ;;  %vm86_vm1 = vcmask 261120   ;;  %v716_v19 = vld [vmem:[%s1040_s2 + $0x10] sm:$0xff]   ;;  %s824_s24 = smov [#allocation7]  }
  0x28   :  { %643 = vmatprep.subr.bf16.mxu1 %v822_v0  ;;  %659 = vmatprep.mubr.msk.bf16.mxu1 %vm823_vm0, %v822_v0  ;;  %v65_v5 = vpack.c.bf16 %v905_v4, %v900_v3  ;;  %v570_v6 = vld [vmem:[%s1043_s5] ss:$0 sm:$0xff]  ;;  %v715_v18 = vld [vmem:[%s1040_s2 + $0x8] sm:$0xff]   ;;  %v717_v20 = vld [vmem:[%s1040_s2 + $0x18] sm:$0xff]   ;;  %s557_s1 = sshll.u32 %s824_s24, 4  ;;  %s558_s1 = int_to_ptr.vmem [resolvable:$true] %s557_s1 }
  0x29   :  { %636 = vmatpush3.bf16.msra.mxu0 %v712_v1  ;;  %v714_v17 = vld [vmem:[%s1040_s2] sm:$0xff]   ;;  %v719_v22 = vld [vmem:[%s1040_s2 + $0x28] sm:$0xff]   ;;  %v720_v23 = vld [vmem:[%s1040_s2 + $0x30] sm:$0xff]   ;;  %p795_p3 = scmp.lt.s32.totalorder %s558_s1, %s558_s1 }
  0x2a   :  { %637 = vmatprep.subr.bf16.mxu0 %v822_v0  ;;  %644 = vmatpush3.bf16.msra.mxu1 %v714_v17  ;;  %v718_v21 = vld [vmem:[%s1040_s2 + $0x20] sm:$0xff]   ;;  %v721_v24 = vld [vmem:[%s1040_s2 + $0x38] sm:$0xff]   ;;  %v722_v25 = vld [vmem:[#allocation5] sm:$0xff]  }
  0x2b   :  { %645 = vmatprep.subr.bf16.mxu1 %v822_v0  ;;  %v723_v26 = vld [vmem:[#allocation5 + $0x8] sm:$0xff]   ;;  %v724_v27 = vld [vmem:[#allocation5 + $0x10] sm:$0xff]   ;;  %v725_v28 = vld [vmem:[#allocation5 + $0x18] sm:$0xff]  }
  0x2c   :  { %v726_v29 = vld [vmem:[#allocation5 + $0x20] sm:$0xff]   ;;  %v727_v30 = vld [vmem:[#allocation5 + $0x28] sm:$0xff]   ;;  %v574_v50 = vld [vmem:[%s1043_s5 + $0x1] ss:$0 sm:$0xff] }
  0x2d   :  { %638 = vmatpush3.bf16.msra.mxu0 %v713_v2  ;;  %v575_v55 = vld [vmem:[%s1043_s5 + $0x2] ss:$0 sm:$0xff]  ;;  %v729_v61 = vld [vmem:[#allocation5 + $0x38] sm:$0xff]   ;;  %v576_v62 = vld [vmem:[%s1043_s5 + $0x3] ss:$0 sm:$0xff] }
  0x2e   :  { %663 = vmatprep.subr.bf16.mxu0 %v822_v0  ;;  %646 = vmatpush3.bf16.msra.mxu1 %v715_v18  ;;  %v728_v60 = vld [vmem:[#allocation5 + $0x30] sm:$0xff]  }
  0x2f   :  { %647 = vmatprep.subr.bf16.mxu1 %v822_v0 }
  0x30   :  { %640 = vmatmul.mubr.msk.bf16.vlgmr.msra.gmra.mrb[0].mxu0 %vm86_vm1, %v65_v5 }
  0x31   :  { %679 = vmatprep.mubr.msk.bf16.mxu0 %vm823_vm0, %v822_v0  ;;  %664 = vmatpush3.bf16.msra.mxu0 %v722_v25  ;;  %v735_v25 = vld [vmem:[%s1042_s4 + $0x28] sm:$0xff]  }
  0x32   :  { %648 = vmatpush3.bf16.msra.mxu1 %v716_v19  ;;  %665 = vmatprep.subr.bf16.mxu0 %v822_v0 }
  0x33   :  { %649 = vmatprep.subr.bf16.mxu1 %v822_v0 }
  0x35   :  { %666 = vmatpush3.bf16.msra.mxu0 %v723_v26  ;;  %v736_v26 = vld [vmem:[%s1042_s4 + $0x30] sm:$0xff]  }
  0x36   :  { %650 = vmatpush3.bf16.msra.mxu1 %v717_v20  ;;  %667 = vmatprep.subr.bf16.mxu0 %v822_v0  ;;  %v730_v20 = vld [vmem:[%s1042_s4] sm:$0xff]  }
  0x37   :  { %651 = vmatprep.subr.bf16.mxu1 %v822_v0 }
  0x39   :  { %668 = vmatpush3.bf16.msra.mxu0 %v724_v27  ;;  %v737_v27 = vld [vmem:[%s1042_s4 + $0x38] sm:$0xff]  }
  0x3a   :  { %652 = vmatpush3.bf16.msra.mxu1 %v718_v21  ;;  %669 = vmatprep.subr.bf16.mxu0 %v822_v0  ;;  %v731_v21 = vld [vmem:[%s1042_s4 + $0x8] sm:$0xff]  }
  0x3b   :  { %653 = vmatprep.subr.bf16.mxu1 %v822_v0 }
  0x3d   :  { %670 = vmatpush3.bf16.msra.mxu0 %v725_v28 }
  0x3e   :  { %654 = vmatpush3.bf16.msra.mxu1 %v719_v22  ;;  %671 = vmatprep.subr.bf16.mxu0 %v822_v0  ;;  %v732_v22 = vld [vmem:[%s1042_s4 + $0x10] sm:$0xff]  }
  0x3f   :  { %655 = vmatprep.subr.bf16.mxu1 %v822_v0 }
  0x41   :  { %672 = vmatpush3.bf16.msra.mxu0 %v726_v29 }
  0x42   :  { %656 = vmatpush3.bf16.msra.mxu1 %v720_v23  ;;  %673 = vmatprep.subr.bf16.mxu0 %v822_v0  ;;  %v733_v23 = vld [vmem:[%s1042_s4 + $0x18] sm:$0xff]  }
  0x43   :  { %657 = vmatprep.subr.bf16.mxu1 %v822_v0 }
  0x45   :  { %674 = vmatpush3.bf16.msra.mxu0 %v727_v30 }
  0x46   :  { %658 = vmatpush3.bf16.msra.mxu1 %v721_v24  ;;  %675 = vmatprep.subr.bf16.mxu0 %v822_v0  ;;  %v734_v24 = vld [vmem:[%s1042_s4 + $0x20] sm:$0xff]  }
  0x47   :  { %683 = vmatprep.subr.bf16.mxu1 %v822_v0 }
  0x49   :  { %676 = vmatpush3.bf16.msra.mxu0 %v728_v60 }
  0x4a   :  { %677 = vmatprep.subr.bf16.mxu0 %v822_v0 }
  0x4d   :  { %678 = vmatpush3.bf16.msra.mxu0 %v729_v61 }
 0x103   :  { %v124_v7 = vpop.f32.mrb[0].mxu0 }
 0x104   :  { %v125_v8 = vadd.f32 %v570_v6, %v124_v7  ;;  %v641_v9 = vpop.f32.mrb[1].mxu0 }
 0x105   :  { %v127_v10 = vpop.f32.mrb[2].mxu0  ;;  %v585_v9 = vld [vmem:[%s1043_s5 + $0x4] ss:$0 sm:$0xff] }
 0x106   :  { %v917_v11 = vmax.f32 %v125_v8, 0.0  ;;  %v128_v12 = vadd.f32 %v570_v6, %v127_v10  ;;  %v642_v13 = vpop.f32.mrb[3].mxu0 }
 0x108   :  { %v919_v14 = vmax.f32 %v128_v12, 0.0  ;;  %133 = vadd.xlane.f32.xlu0 %v917_v11  ;;  %v137_v15 = vmul.f32 %v917_v11, %v917_v11 }
 0x10a   :  { %139 = vadd.xlane.f32.xlu1 %v137_v15  ;;  %v138_v16 = vmul.f32 %v919_v14, %v919_v14 }
 0x10c   :  { %135 = vadd.xlane.f32.xlu0 %v919_v14 }
 0x10e   :  { %141 = vadd.xlane.f32.xlu1 %v138_v16 }
 0x195   :  { %v134_v31 = vpop.xlane.xlu0 %133 }
 0x196   :  { %v143_v32 = vmul.f32 0.015625, %v134_v31 }
 0x197   :  { %v140_v33 = vpop.xlane.xlu1 %139 }
 0x198   :  { %v147_v34 = vmul.f32 %v143_v32, %v143_v32  ;;  %v145_v35 = vmul.f32 0.015625, %v140_v33  ;;  %v153_v47 = vsub.f32 %v917_v11, %v143_v32 }
 0x199   :  { %v136_v36 = vpop.xlane.xlu0 %135 }
 0x19a   :  { %v149_v37 = vsub.f32 %v145_v35, %v147_v34  ;;  %v144_v38 = vmul.f32 0.015625, %v136_v36 }
 0x19b   :  { %v142_v39 = vpop.xlane.xlu1 %141 }
 0x19c   :  { %v151_v40 = vmax.f32 %v149_v37, 0.0  ;;  %v148_v41 = vmul.f32 %v144_v38, %v144_v38  ;;  %v146_v42 = vmul.f32 0.015625, %v142_v39  ;;  %v154_v51 = vsub.f32 %v919_v14, %v144_v38 }
 0x19e   :  { %v155_v43 = vadd.f32 1e-05, %v151_v40  ;;  %v150_v44 = vsub.f32 %v146_v42, %v148_v41 }
 0x1a0   :  { %738 = vrsqrt.f32 %v155_v43  ;;  %v152_v45 = vmax.f32 %v150_v44, 0.0 }
 0x1a2   :  { %v156_v46 = vadd.f32 1e-05, %v152_v45  ;;  %v594_v45 = vld [vmem:[%s1043_s5 + $0x5] ss:$0 sm:$0xff] }
 0x1a4   :  { %740 = vrsqrt.f32 %v156_v46 }
 0x1aa   :  { %v739_v48 = vpop.eup %738 }
 0x1ab   :  { %v159_v49 = vmul.f32 %v739_v48, %v153_v47 }
 0x1ad   :  { %v165_v54 = vmul.f32 %v574_v50, %v159_v49 }
 0x1ae   :  { %v741_v52 = vpop.eup %740 }
 0x1af   :  { %v160_v53 = vmul.f32 %v741_v52, %v154_v51  ;;  %v171_v57 = vadd.f32 %v575_v55, %v165_v54  ;;  %v595_v51 = vld [vmem:[%s1043_s5 + $0x6] ss:$0 sm:$0xff]  ;;  %s790_s5 = scalar_lea.vmem %s558_s1, 256 }
 0x1b0   :  { %p791_p2 = scmp.ne.s32.totalorder %s558_s1, %s790_s5  ;;  %p796_p4 = scmp.lt.s32.totalorder %s790_s5, %s790_s5 }
 0x1b1   :  { %v166_v56 = vmul.f32 %v574_v50, %v160_v53 }
 0x1b2   :  { %p797_p5 = por %p796_p4, %p795_p3 }
 0x1b3   :  { %v172_v58 = vadd.f32 %v575_v55, %v166_v56  ;;  %v596_v56 = vld [vmem:[%s1044_s6] ss:$0 sm:$0xff] }
 0x1b4   :  { %p798_p6 = pnand %p797_p5, %p791_p2 }
 0x1b5   :  { %v173_v59 = vpack.c.bf16 %v172_v58, %v171_v57 }
 0x1b7   :  { %660 = vmatmul.mubr.bf16.vlgmr.msra.gmra.mrb[0].mxu1 %v173_v59 }
 0x1b8   :  { %699 = vmatprep.mubr.msk.bf16.mxu1 %vm823_vm0, %v822_v0  ;;  %684 = vmatpush3.bf16.msra.mxu1 %v730_v20 }
 0x1b9   :  { %685 = vmatprep.subr.bf16.mxu1 %v822_v0 }
 0x1bc   :  { %686 = vmatpush3.bf16.msra.mxu1 %v731_v21 }
 0x1bd   :  { %687 = vmatprep.subr.bf16.mxu1 %v822_v0 }
 0x1c0   :  { %688 = vmatpush3.bf16.msra.mxu1 %v732_v22 }
 0x1c1   :  { %689 = vmatprep.subr.bf16.mxu1 %v822_v0 }
 0x1c4   :  { %690 = vmatpush3.bf16.msra.mxu1 %v733_v23 }
 0x1c5   :  { %691 = vmatprep.subr.bf16.mxu1 %v822_v0 }
 0x1c8   :  { %692 = vmatpush3.bf16.msra.mxu1 %v734_v24 }
 0x1c9   :  { %693 = vmatprep.subr.bf16.mxu1 %v822_v0 }
 0x1cc   :  { %694 = vmatpush3.bf16.msra.mxu1 %v735_v25 }
 0x1cd   :  { %695 = vmatprep.subr.bf16.mxu1 %v822_v0 }
 0x1d0   :  { %696 = vmatpush3.bf16.msra.mxu1 %v736_v26 }
 0x1d1   :  { %697 = vmatprep.subr.bf16.mxu1 %v822_v0 }
 0x1d4   :  { %698 = vmatpush3.bf16.msra.mxu1 %v737_v27 }
 0x28a   :  { %v276_v63 = vpop.f32.mrb[0].mxu1 }
 0x28b   :  { %v661_v1 = vpop.f32.mrb[1].mxu1  ;;  %v277_v5 = vadd.f32 %v576_v62, %v276_v63 }
 0x28c   :  { %v279_v2 = vpop.f32.mrb[2].mxu1 }
 0x28d   :  { %v280_v6 = vadd.f32 %v576_v62, %v279_v2  ;;  %v662_v7 = vpop.f32.mrb[3].mxu1 }
 0x28f   :  { %v283_v8 = vpack.c.bf16 %v280_v6, %v277_v5 }
 0x291   :  { %680 = vmatmul.mubr.bf16.vlgmr.msra.gmra.mrb[4].mxu0 %v283_v8 }
 0x364   :  { %v386_v10 = vpop.f32.mrb[4].mxu0 }
 0x365   :  { %v387_v11 = vadd.f32 %v585_v9, %v386_v10  ;;  %v681_v12 = vpop.f32.mrb[5].mxu0 }
 0x366   :  { %v389_v13 = vpop.f32.mrb[6].mxu0 }
 0x367   :  { %v393_v14 = vmax.f32 %v387_v11, 0.0  ;;  %v390_v15 = vadd.f32 %v585_v9, %v389_v13  ;;  %v682_v16 = vpop.f32.mrb[7].mxu0 }
 0x369   :  { %v394_v17 = vmax.f32 %v390_v15, 0.0  ;;  %395 = vadd.xlane.f32.xlu0 %v393_v14  ;;  %v399_v18 = vmul.f32 %v393_v14, %v393_v14 }
 0x36b   :  { %397 = vadd.xlane.f32.xlu1 %v394_v17  ;;  %v400_v19 = vmul.f32 %v394_v17, %v394_v17 }
 0x36d   :  { %401 = vadd.xlane.f32.xlu0 %v399_v18 }
 0x36f   :  { %403 = vadd.xlane.f32.xlu1 %v400_v19 }
 0x3f6   :  { %v396_v28 = vpop.xlane.xlu0 %395 }
 0x3f7   :  { %v405_v29 = vmul.f32 0.015625, %v396_v28 }
 0x3f8   :  { %v398_v30 = vpop.xlane.xlu1 %397 }
 0x3f9   :  { %v406_v31 = vmul.f32 0.015625, %v398_v30  ;;  %v409_v33 = vmul.f32 %v405_v29, %v405_v29  ;;  %v415_v0 = vsub.f32 %v393_v14, %v405_v29 }
 0x3fa   :  { %v402_v32 = vpop.xlane.xlu0 %401 }
 0x3fb   :  { %v407_v34 = vmul.f32 0.015625, %v402_v32  ;;  %v410_v36 = vmul.f32 %v406_v31, %v406_v31  ;;  %v416_v46 = vsub.f32 %v394_v17, %v406_v31 }
 0x3fc   :  { %v404_v35 = vpop.xlane.xlu1 %403 }
 0x3fd   :  { %v411_v37 = vsub.f32 %v407_v34, %v409_v33  ;;  %v408_v38 = vmul.f32 0.015625, %v404_v35 }
 0x3ff   :  { %v413_v39 = vmax.f32 %v411_v37, 0.0  ;;  %v412_v40 = vsub.f32 %v408_v38, %v410_v36 }
 0x401   :  { %v417_v41 = vadd.f32 1e-05, %v413_v39  ;;  %v414_v42 = vmax.f32 %v412_v40, 0.0 }
 0x403   :  { %742 = vrsqrt.f32 %v417_v41  ;;  %v418_v43 = vadd.f32 1e-05, %v414_v42 }
 0x405   :  { %744 = vrsqrt.f32 %v418_v43 }
 0x40d   :  { %v743_v44 = vpop.eup %742 }
 0x40e   :  { %v421_v47 = vmul.f32 %v743_v44, %v415_v0 }
 0x40f   :  { %v745_v48 = vpop.eup %744 }
 0x410   :  { %v422_v49 = vmul.f32 %v745_v48, %v416_v46  ;;  %v427_v50 = vmul.f32 %v594_v45, %v421_v47 }
 0x412   :  { %v428_v52 = vmul.f32 %v594_v45, %v422_v49  ;;  %v433_v53 = vadd.f32 %v595_v51, %v427_v50 }
 0x414   :  { %v434_v54 = vadd.f32 %v595_v51, %v428_v52 }
 0x416   :  { %v435_v55 = vpack.c.bf16 %v434_v54, %v433_v53 }
 0x418   :  { %700 = vmatmul.mubr.bf16.vlgmr.msra.gmra.mrb[4].mxu1 %v435_v55 }
 0x4eb   :  { %v541_v57 = vpop.f32.mrb[4].mxu1 }
 0x4ec   :  { %v542_v58 = vadd.f32 %v596_v56, %v541_v57  ;;  %v701_v59 = vpop.f32.mrb[5].mxu1 }
 0x4ed   :  { %v544_v60 = vpop.f32.mrb[6].mxu1 }
 0x4ee   :  { %v548_v61 = vadd.f32 %v542_v58, %v900_v3  ;;  %v545_v62 = vadd.f32 %v596_v56, %v544_v60  ;;  %v702_v63 = vpop.f32.mrb[7].mxu1 }
 0x4f0   :  { %550 = vst.msk [vmem:[#allocation7] sm:$0xff] %vm86_vm1, %v548_v61  ;;  %v549_v1 = vadd.f32 %v545_v62, %v905_v4 }
 0x4f2   :  { %551 = vst.msk [vmem:[#allocation7 + $0x8] sm:$0xff] %vm86_vm1, %v549_v1 }
 0x4f3   :  { %801 = shalt.err (!%p798_p6)
}
 0x4f4   :  { %s802_s3 = scalar_lea.hbm %s1045_s7, 256 }
 0x4f5   :  { %p803_p7 = scmp.ne.s32.totalorder %s1045_s7, %s802_s3  ;;  %p806_p8 = scmp.lt.u32.totalorder %s802_s3, %s1045_s7 }
 0x4f7   :  { %p808_p9 = pnand %p806_p8, %p803_p7 }
 0x4f9   :  { %811 = shalt.err (!%p808_p9)
}
 0x4fa   :  { %s825_s30 = smov 128   ;;  %s826_s0 = smov 8  }
 0x4fb   :  { %563 = dma.vmem_to_hbm [thread:$0]  %s558_s1, 256, %s1045_s7, [#allocation4], %s825_s30, %s825_s30, %s826_s0  }
 0x4fc   :  { %816 = dma.done.wait [#allocation4], 256  }
 0x4fd   :  { %817 = vsyncadd [#allocation4], 4294967040 }
 0x4fe   :  { %567 = vsyncpa [#allocation3], 1 }
 0x4ff   :  { %568 = vsyncpa [#allocation6], 1 }
 0x500   :  { %569 = vsyncpa [#allocation4], 1 }

</bundles_post_ra>
